<compile_context>
chip_gen: v6e
topology: v6e:2x2x1
jax: 0.10.0
libtpu: 0.0.40
codegen_flags: <defaults>
</compile_context>

<pallas_src>
import math

import jax
import jax.numpy as jnp
from jax import lax
from jax.experimental import pallas as pl
from jax.experimental.pallas import tpu as pltpu


def _make_kernel(D, proj_chunk, n_proj_chunks):
    def kernel(x_ref, wqkv_ref, bqkv_ref, o_ref, q_scr, k_scr, v_scr):
        qi = pl.program_id(1)
        TQ = o_ref.shape[0]

        # ---- fused Q|K|V projection: once per batch element, chunked over S
        # rows so the f32 (chunk, 3D) intermediate stays bounded. -------------
        @pl.when(qi == 0)
        def _():
            def proj_body(c, carry):
                r = pl.multiple_of(c * proj_chunk, proj_chunk)
                xc = x_ref[pl.ds(r, proj_chunk), :]                # (chunk, D) bf16
                qkv = (jnp.dot(xc, wqkv_ref[...],
                               preferred_element_type=jnp.float32)
                       + bqkv_ref[...])                            # (chunk, 3D) f32
                q_scr[pl.ds(r, proj_chunk), :] = qkv[:, :D].astype(jnp.bfloat16)
                k_scr[pl.ds(r, proj_chunk), :] = qkv[:, D:2 * D].astype(jnp.bfloat16)
                v_scr[pl.ds(r, proj_chunk), :] = qkv[:, 2 * D:].astype(jnp.bfloat16)
                return carry

            lax.fori_loop(0, n_proj_chunks, proj_body, 0)

        # ---- attention for this query tile ----------------------------------
        row0 = pl.multiple_of(qi * TQ, TQ)
        q = q_scr[pl.ds(row0, TQ), :]            # (TQ, D) bf16, 1/sqrt(D) pre-folded

        # scores = (Q / sqrt(D)) @ K^T as a trans_b matmul (no materialized K.T)
        score = lax.dot_general(
            q, k_scr[...],
            dimension_numbers=(((1,), (1,)), ((), ())),
            preferred_element_type=jnp.float32)                    # (TQ, S)

        # numerically stable softmax in f32; normalization deferred to the
        # (TQ, D) output instead of the (TQ, S) probability tile.
        m = jnp.max(score, axis=-1, keepdims=True)
        p = jnp.exp(score - m)                                     # unnormalized
        denom = jnp.sum(p, axis=-1, keepdims=True)                 # (TQ, 1)

        out = jnp.dot(p.astype(jnp.bfloat16), v_scr[...],
                      preferred_element_type=jnp.float32)          # (TQ, D)
        out = out * pl.reciprocal(denom, approx=True)              # EUP slot
        o_ref[...] = out.astype(o_ref.dtype)

    return kernel


def _pick_block_q(S):
    # Cap TQ so the live softmax intermediates (~10*TQ*S bytes: f32 score,
    # f32 p, bf16 p copy) stay within ~6 MiB.
    budget = 6 * 1024 * 1024
    cap = max(128, budget // (10 * S))
    for cand in (1024, 512, 256, 128):
        if cand <= cap and S % cand == 0 and S > cand:
            return cand
    if S > 1024:
        raise ValueError(
            "for long sequences S must be a multiple of 128/256/512 (pad S) "
            "to avoid an (S, S) score working set")
    return S


def _pick_proj_chunk(S, D):
    # Bound the f32 (chunk, 3D) projection intermediate to ~4 MiB.
    budget = 4 * 1024 * 1024
    cap = max(128, budget // (12 * D))
    for cand in (1024, 512, 256, 128):
        if cand <= cap and S % cand == 0 and S > cand:
            return cand
    return S


def self_attention(x, wq, bq, wk, bk, wv, bv, *, block_q=None):
    """x: [B, S, D]; wq/wk/wv: [D, D] (pre-transposed to in x out); b*: [D]."""
    B, S, D = x.shape
    out_dtype = x.dtype
    scale = 1.0 / math.sqrt(float(D))

    # Fold the softmax scale into the Q projection and fuse Q|K|V weights into
    # one wide [D, 3D] matmul operand; bf16 MXU operands, f32 bias.
    wqkv = jnp.concatenate([wq * scale, wk, wv], axis=1).astype(jnp.bfloat16)
    bqkv = jnp.concatenate([bq * scale, bk, bv]).reshape(1, 3 * D).astype(jnp.float32)

    # bf16 activations at the boundary: halves the x DMA and its VMEM block.
    x_bf16 = x.astype(jnp.bfloat16)

    if block_q is None:
        block_q = _pick_block_q(S)
    assert S % block_q == 0, "S must be divisible by the query tile size"
    n_q = S // block_q

    proj_chunk = _pick_proj_chunk(S, D)
    n_proj_chunks = S // proj_chunk

    # VMEM budget re-derived from the actual shapes, capped generation-aware.
    needed = (
        2 * S * D * 2                                    # double-buffered bf16 x block
        + 2 * (3 * D * D * 2 + 3 * D * 4)                # wqkv + bqkv blocks
        + 3 * S * D * 2                                  # resident Q/K/V bf16 scratch
        + 2 * block_q * D * jnp.dtype(out_dtype).itemsize  # output tile
        + 10 * block_q * S                               # f32 score + f32 p + bf16 p
        + proj_chunk * 3 * D * 4                         # f32 projection chunk
    )
    try:
        phys = getattr(pltpu.get_tpu_info(), "vmem_capacity_bytes", None)
    except Exception:
        phys = None
    if not phys:
        phys = 64 * 1024 * 1024          # conservative: v7x per-core VMEM
    cap = min(phys * 7 // 8, 100 * 1024 * 1024)
    vmem_limit = int(max(32 * 1024 * 1024, min(int(needed * 1.25), cap)))

    kernel = _make_kernel(D, proj_chunk, n_proj_chunks)

    grid_spec = pltpu.PrefetchScalarGridSpec(
        num_scalar_prefetch=0,
        grid=(B, n_q),
        in_specs=[
            # single full-sequence x block per batch element; constant index
            # over qi -> resident across query tiles (no duplicate q stream).
            pl.BlockSpec((None, S, D), lambda b, qi: (b, 0, 0)),
            # fused weights / biases: constant index maps -> no re-DMA.
            pl.BlockSpec((D, 3 * D), lambda b, qi: (0, 0)),   # Wq*s | Wk | Wv
            pl.BlockSpec((1, 3 * D), lambda b, qi: (0, 0)),   # bq*s | bk | bv
        ],
        out_specs=pl.BlockSpec((None, block_q, D), lambda b, qi: (b, qi, 0)),
        scratch_shapes=[
            pltpu.VMEM((S, D), jnp.bfloat16),   # projected Q (scaled), per batch elem
            pltpu.VMEM((S, D), jnp.bfloat16),   # projected K
            pltpu.VMEM((S, D), jnp.bfloat16),   # projected V
        ],
    )

    return pl.pallas_call(
        kernel,
        out_shape=jax.ShapeDtypeStruct((B, S, D), out_dtype),
        grid_spec=grid_spec,
        compiler_params=pltpu.CompilerParams(
            # batch axis parallel (megacore); qi carries the resident Q/K/V
            # scratch state so it must stay "arbitrary" (sequential).
            dimension_semantics=("parallel", "arbitrary"),
            vmem_limit_bytes=vmem_limit,
        ),
    )(x_bf16, wqkv, bqkv)


def self_attention_ref(x, wq, bq, wk, bk, wv, bv):
    """Pure-JAX f32 reference mirroring the PyTorch forward."""
    q = jnp.einsum("bsd,de->bse", x, wq) + bq
    k = jnp.einsum("bsd,de->bse", x, wk) + bk
    v = jnp.einsum("bsd,de->bse", x, wv) + bv
    score = jnp.einsum("bqd,bkd->bqk", q, k) / math.sqrt(x.shape[-1])
    attn = jax.nn.softmax(score, axis=2)
    return jnp.einsum("bqk,bkd->bqd", attn, v)


if __name__ == "__main__":
    B, S, D = 2, 8, 32  # batch, seq, hidden (input_dim)

    key = jax.random.PRNGKey(0)
    kx, kq, kbq, kk, kbk, kv, kbv = jax.random.split(key, 7)

    x = jax.random.normal(kx, (B, S, D), dtype=jnp.float32)

    # nn.Linear(input_dim, input_dim): weight [out, in], bias [out].
    # Deterministic init; stored pre-transposed as [in, out] for the kernel.
    bound = 1.0 / math.sqrt(D)
    wq = jax.random.uniform(kq, (D, D), jnp.float32, -bound, bound).T
    bq = jax.random.uniform(kbq, (D,), jnp.float32, -bound, bound)
    wk = jax.random.uniform(kk, (D, D), jnp.float32, -bound, bound).T
    bk = jax.random.uniform(kbk, (D,), jnp.float32, -bound, bound)
    wv = jax.random.uniform(kv, (D, D), jnp.float32, -bound, bound).T
    bv = jax.random.uniform(kbv, (D,), jnp.float32, -bound, bound)

    out = self_attention(x, wq, bq, wk, bk, wv, bv)
    out = jax.block_until_ready(out)

    ref = self_attention_ref(x, wq, bq, wk, bk, wv, bv)
    assert out.shape == (B, S, D)
    # bf16 MXU operands + approx reciprocal -> looser tolerance than pure f32.
    assert jnp.allclose(out, ref, atol=5e-2, rtol=5e-2), "mismatch vs reference"

    print("KERNEL_OK")
</pallas_src>

<mosaic_0001>
module attributes {stable_mosaic.version = 11 : i64} {
  func.func @kernel(%arg0: i32, %arg1: i32, %arg2: memref<1x8x32xbf16, #tpu.memory_space<vmem>>, %arg3: memref<32x96xbf16, #tpu.memory_space<vmem>>, %arg4: memref<1x96xf32, #tpu.memory_space<vmem>>, %arg5: memref<1x8x32xf32, #tpu.memory_space<vmem>>, %arg6: memref<8x32xbf16, #tpu.memory_space<vmem>>, %arg7: memref<8x32xbf16, #tpu.memory_space<vmem>>, %arg8: memref<8x32xbf16, #tpu.memory_space<vmem>>) attributes {dimension_semantics = [#tpu.dimension_semantics<parallel>, #tpu.dimension_semantics<arbitrary>], iteration_bounds = array<i64: 2, 1>, scalar_prefetch = 0 : i64, scratch_operands = 3 : i64, tpu.core_type = #tpu.core_type<tc>, window_params = [{transform_indices = @transform_0, window_bounds = array<i64: 1, 8, 32>}, {pipeline_mode = #tpu.pipeline_mode<synchronous>, transform_indices = @transform_1, window_bounds = array<i64: 32, 96>}, {pipeline_mode = #tpu.pipeline_mode<synchronous>, transform_indices = @transform_2, window_bounds = array<i64: 1, 96>}, {transform_indices = @transform_3, window_bounds = array<i64: 1, 8, 32>}]} {
    %c0_i32 = arith.constant 0 : i32
    %0 = arith.cmpi eq, %arg1, %c0_i32 : i32
    %1 = arith.extui %0 : i1 to i32
    %c0_i32_0 = arith.constant 0 : i32
    %2 = arith.cmpi ne, %1, %c0_i32_0 : i32
    scf.if %2 {
      %c0_i32_11 = arith.constant 0 : i32
      %c8_i32_12 = arith.constant 8 : i32
      %25 = arith.muli %c0_i32_11, %c8_i32_12 : i32
      %26 = tpu.assume_multiple %25, 8 : i32
      %c0_13 = arith.constant 0 : index
      %27 = arith.index_cast %26 : i32 to index
      %c0_14 = arith.constant 0 : index
      %28 = vector.load %arg2[%c0_13, %27, %c0_14] : memref<1x8x32xbf16, #tpu.memory_space<vmem>>, vector<1x8x32xbf16>
      %29 = vector.shape_cast %28 : vector<1x8x32xbf16> to vector<8x32xbf16>
      %c0_15 = arith.constant 0 : index
      %c0_16 = arith.constant 0 : index
      %30 = vector.load %arg3[%c0_15, %c0_16] : memref<32x96xbf16, #tpu.memory_space<vmem>>, vector<32x96xbf16>
      %cst_17 = arith.constant dense<0.000000e+00> : vector<8x96xf32>
      %31 = tpu.matmul %29, %30, %cst_17 {dimension_numbers = #tpu.dot_dimension_numbers<[1], [0], [0], [1], [0, 0, 1, 1], [], []>} : vector<8x32xbf16>, vector<32x96xbf16>, vector<8x96xf32> -> vector<8x96xf32>
      %c0_18 = arith.constant 0 : index
      %c0_19 = arith.constant 0 : index
      %32 = vector.load %arg4[%c0_18, %c0_19] : memref<1x96xf32, #tpu.memory_space<vmem>>, vector<1x96xf32>
      %33 = vector.broadcast %32 : vector<1x96xf32> to vector<8x96xf32>
      %34 = arith.addf %31, %33 : vector<8x96xf32>
      %35 = vector.extract_strided_slice %34 {offsets = [0, 0], sizes = [8, 32], strides = [1, 1]} : vector<8x96xf32> to vector<8x32xf32>
      %36 = arith.truncf %35 : vector<8x32xf32> to vector<8x32xbf16>
      %37 = arith.index_cast %26 : i32 to index
      %c0_20 = arith.constant 0 : index
      %38 = vector.load %arg6[%37, %c0_20] : memref<8x32xbf16, #tpu.memory_space<vmem>>, vector<8x32xbf16>
      tpu.vector_store %arg6[%37, %c0_20], %36 {strides = array<i32>} : memref<8x32xbf16, #tpu.memory_space<vmem>>, vector<8x32xbf16>,
      %39 = vector.extract_strided_slice %34 {offsets = [0, 32], sizes = [8, 32], strides = [1, 1]} : vector<8x96xf32> to vector<8x32xf32>
      %40 = arith.truncf %39 : vector<8x32xf32> to vector<8x32xbf16>
      %41 = arith.index_cast %26 : i32 to index
      %c0_21 = arith.constant 0 : index
      %42 = vector.load %arg7[%41, %c0_21] : memref<8x32xbf16, #tpu.memory_space<vmem>>, vector<8x32xbf16>
      tpu.vector_store %arg7[%41, %c0_21], %40 {strides = array<i32>} : memref<8x32xbf16, #tpu.memory_space<vmem>>, vector<8x32xbf16>,
      %43 = vector.extract_strided_slice %34 {offsets = [0, 64], sizes = [8, 32], strides = [1, 1]} : vector<8x96xf32> to vector<8x32xf32>
      %44 = arith.truncf %43 : vector<8x32xf32> to vector<8x32xbf16>
      %45 = arith.index_cast %26 : i32 to index
      %c0_22 = arith.constant 0 : index
      %46 = vector.load %arg8[%45, %c0_22] : memref<8x32xbf16, #tpu.memory_space<vmem>>, vector<8x32xbf16>
      tpu.vector_store %arg8[%45, %c0_22], %44 {strides = array<i32>} : memref<8x32xbf16, #tpu.memory_space<vmem>>, vector<8x32xbf16>,
      %c1_i32 = arith.constant 1 : i32
    } else {
    }
    %c8_i32 = arith.constant 8 : i32
    %3 = arith.muli %arg1, %c8_i32 : i32
    %4 = tpu.assume_multiple %3, 8 : i32
    %5 = arith.index_cast %4 : i32 to index
    %c0 = arith.constant 0 : index
    %6 = vector.load %arg6[%5, %c0] : memref<8x32xbf16, #tpu.memory_space<vmem>>, vector<8x32xbf16>
    %c0_1 = arith.constant 0 : index
    %c0_2 = arith.constant 0 : index
    %7 = vector.load %arg7[%c0_1, %c0_2] : memref<8x32xbf16, #tpu.memory_space<vmem>>, vector<8x32xbf16>
    %cst = arith.constant dense<0.000000e+00> : vector<8x8xf32>
    %8 = tpu.matmul %6, %7, %cst {dimension_numbers = #tpu.dot_dimension_numbers<[1], [1], [0], [0], [0, 0, 1, 0], [], []>} : vector<8x32xbf16>, vector<8x32xbf16>, vector<8x8xf32> -> vector<8x8xf32>
    %cst_3 = arith.constant dense<0xFF800000> : vector<8xf32>
    %9 = vector.multi_reduction <maximumf>, %8, %cst_3 [1] : vector<8x8xf32> to vector<8xf32>
    %10 = vector.shape_cast %9 : vector<8xf32> to vector<8x1xf32>
    %11 = vector.broadcast %10 : vector<8x1xf32> to vector<8x8xf32>
    %12 = arith.subf %8, %11 : vector<8x8xf32>
    %13 = math.exp %12 : vector<8x8xf32>
    %cst_4 = arith.constant dense<0.000000e+00> : vector<8xf32>
    %14 = vector.multi_reduction <add>, %13, %cst_4 [1] : vector<8x8xf32> to vector<8xf32>
    %15 = vector.shape_cast %14 : vector<8xf32> to vector<8x1xf32>
    %16 = arith.truncf %13 : vector<8x8xf32> to vector<8x8xbf16>
    %c0_5 = arith.constant 0 : index
    %c0_6 = arith.constant 0 : index
    %17 = vector.load %arg8[%c0_5, %c0_6] : memref<8x32xbf16, #tpu.memory_space<vmem>>, vector<8x32xbf16>
    %cst_7 = arith.constant dense<0.000000e+00> : vector<8x32xf32>
    %18 = tpu.matmul %16, %17, %cst_7 {dimension_numbers = #tpu.dot_dimension_numbers<[1], [0], [0], [1], [0, 0, 1, 1], [], []>} : vector<8x8xbf16>, vector<8x32xbf16>, vector<8x32xf32> -> vector<8x32xf32>
    %19 = tpu.reciprocal %15 {approx = true} : vector<8x1xf32> -> vector<8x1xf32>
    %20 = vector.broadcast %19 : vector<8x1xf32> to vector<8x32xf32>
    %21 = arith.mulf %18, %20 : vector<8x32xf32>
    %c0_8 = arith.constant 0 : index
    %c0_9 = arith.constant 0 : index
    %c0_10 = arith.constant 0 : index
    %22 = vector.load %arg5[%c0_8, %c0_9, %c0_10] : memref<1x8x32xf32, #tpu.memory_space<vmem>>, vector<1x8x32xf32>
    %23 = vector.shape_cast %22 : vector<1x8x32xf32> to vector<8x32xf32>
    %24 = vector.shape_cast %21 : vector<8x32xf32> to vector<1x8x32xf32>
    tpu.vector_store %arg5[%c0_8, %c0_9, %c0_10], %24 {strides = array<i32>} : memref<1x8x32xf32, #tpu.memory_space<vmem>>, vector<1x8x32xf32>,
    return
  }
  func.func @transform_0(%arg0: i32, %arg1: i32) -> (i32, i32, i32) {
    %c0_i32 = arith.constant 0 : i32
    %c0_i32_0 = arith.constant 0 : i32
    %c0_i32_1 = arith.constant 0 : i32
    return %arg0, %c0_i32, %c0_i32_0 : i32, i32, i32
  }
  func.func @transform_1(%arg0: i32, %arg1: i32) -> (i32, i32) {
    %c0_i32 = arith.constant 0 : i32
    %c0_i32_0 = arith.constant 0 : i32
    %c0_i32_1 = arith.constant 0 : i32
    return %c0_i32, %c0_i32_0 : i32, i32
  }
  func.func @transform_2(%arg0: i32, %arg1: i32) -> (i32, i32) {
    %c0_i32 = arith.constant 0 : i32
    %c0_i32_0 = arith.constant 0 : i32
    %c0_i32_1 = arith.constant 0 : i32
    return %c0_i32, %c0_i32_0 : i32, i32
  }
  func.func @transform_3(%arg0: i32, %arg1: i32) -> (i32, i32, i32) {
    %c0_i32 = arith.constant 0 : i32
    %c0_i32_0 = arith.constant 0 : i32
    return %arg0, %arg1, %c0_i32 : i32, i32, i32
  }
}

</mosaic_0001>

<bundles_post_ra>
// kernel: tpu_custom_call.1
= control target key start
LH: loop header
LB: loop body
LE: loop exit
PB: predicated region body
PF: predicated region fallthrough
CT: control target
= control target key end

     0   :  { %8 = vsyncpa [#allocation6], 0  ;;  %s1015_s0 = inlined_call_operand.hbm [shape: bf16[2,8,32], index: 0, kind: input, shape index: {}]   ;;  %s1016_s1 = inlined_call_operand.hbm [shape: bf16[32,96], index: 1, kind: input, shape index: {}]   ;;  %s1017_s2 = inlined_call_operand.vmem [shape: f32[1,96], index: 2, kind: input, shape index: {}]   ;;  %s1018_s3 = inlined_call_operand.hbm [shape: f32[2,8,32], index: 3, kind: output, shape index: {}]  }
   0x1   :  { %10 = vsyncpa [#allocation6 + $0x1], 0 }
   0x2   :  { %11 = vsyncpa [#allocation9], 0 }
   0x3   :  { %12 = vsyncpa [#allocation7], 0 }
   0x4   :  { %14 = vsyncpa [#allocation7 + $0x1], 0  ;;  %s828_s12 = smov 0   ;;  %s830_s13 = smov 0  }
   0x5   :  { %s832_s14 = smov 0   ;;  %s834_s15 = smov 0  }
   0x6   :  { %s836_s16 = smov 0   ;;  %s838_s17 = smov 0  }
   0x7 LB: > { %s524_s18 = sadd.s32 4294967295, %s797_s17   ;;  %s525_s19 = sadd.s32 4294967294, %s797_s17   ;;  %s797_s17 = sphi %s838_s17, %s20_s17   ;;  %s793_s16 = sphi %s836_s16, %s1036_s16   ;;  %s789_s15 = sphi %s834_s15, %s1035_s15   ;;  %s785_s14 = sphi %s832_s14, %s1034_s14   ;;  %s781_s13 = sphi %s830_s13, %s1033_s13   ;;  %s777_s12 = sphi %s828_s12, %s1032_s12  }
   0x8   : > { %p52_p0 = scmp.ne.s32.totalorder %s781_s13, %s777_s12  ;;  %p862_p1 = scmp.eq.s32.totalorder %s524_s18, 0 }
   0x9   : > { %p866_p2 = scmp.eq.s32.totalorder %s524_s18, 1  ;;  %p126_p3 = scmp.eq.s32.totalorder %s525_s19, 1 }
   0xa   : > { %p872_p4 = por %p862_p1, %p52_p0  ;;  %p526_p5 = scmp.ge.s32.totalorder %s797_s17, 1 }
   0xb   : > { %p877_p6 = por %p126_p3, %p52_p0  ;;  %p133_p7 = scmp.lt.s32.totalorder %s797_s17, 3 }
   0xc   : > { %s1022_s22 = scalar_select %p872_p4, 1, 0 }
   0xd   : > { %s1023_s23 = scalar_select %p877_p6, 1, 0 }
   0xe   : > { %p882_p8 = pnand %p526_p5, %p133_p7  ;;  %s799_s25 = smov [#allocation8]  }
   0xf   : > { %s145_s26 = sshll.u32 %s799_s25, 4  ;;  %s32_s28 = sadd.s32 1, %s793_s16  ;;  %s146_s26 = int_to_ptr.vmem [resolvable:$true] %s145_s26 }
  0x10   : > { %p582_p9 = pneg %p882_p8  ;;  %s670_s29 = scalar_lea.vmem %s146_s26, 256 }
  0x11   : > { %p671_p13 = scmp.ne.s32.totalorder %s146_s26, %s670_s29  ;;  %p678_p5 = scmp.lt.s32.totalorder %s146_s26, %s146_s26 }
  0x12   : > { %p891_p11 = pnand %p582_p9, %p862_p1  ;;  %p679_p7 = scmp.lt.s32.totalorder %s670_s29, %s670_s29 }
  0x14   : > { %p661_p12 = pneg %p891_p11  ;;  %p680_p6 = por %p679_p7, %p678_p5 }
  0x16   : > { %p673_p0 = pnand %p671_p13, %p661_p12 }
  0x18   : > { %p674_p3 = pneg %p673_p0 }
  0x1a   : > { %p681_p4 = pnand %p680_p6, %p674_p3 }
  0x1c   : > { %684 = shalt.err (!%p681_p4)
}
  0x1d   : > { %s800_s30 = smov 64   ;;  %s801_s4 = smov 4  }
  0x1e   : > { %585 = dma.hbm_to_vmem [thread:$0]  (!%p891_p11), %s1016_s1, 256, %s146_s26, [#allocation9], %s800_s30, %s800_s30, %s801_s4  }
  0x1f   : > { %p34_p6 = scmp.ge.s32.totalorder %s32_s28, 2  ;;  %s39_s7 = sadd.s32 1, %s785_s14 }
  0x20   : > { %p46_p4 = scmp.ne.s32.totalorder %s785_s14, %s781_s13  ;;  %p47_p9 = scmp.eq.s32.totalorder %s797_s17, 0 }
  0x21   : > { %s1038_s28 = smov (%p34_p6, %s32_s28), 0  ;;  %p595_p0 = scmp.lt.s32.totalorder %s797_s17, 2 }
  0x22   : > { %p909_p12 = por %p47_p9, %p46_p4  ;;  %p915_p13 = por %p866_p2, %p46_p4 }
  0x23   : > { %s36_s10 = ssub.s32 %s793_s16, %s1038_s28  ;;  %s162_s11 = sand.u32 1, %s785_s14  }
  0x24   : > { %p37_p11 = scmp.eq.s32.totalorder %s36_s10, 0  ;;  %s529_s18 = sshll.u32 %s162_s11, 2 }
  0x25   : > { %s530_s25 = sshll.u32 %s793_s16, 6  ;;  %s166_s30 = scalar_lea.vmem [#allocation5], %s529_s18 }
  0x26   : > { %s924_s19 = scalar_select %p37_p11, %s785_s14, %s39_s7  }
  0x27   : > { %s171_s29 = scalar_lea.hbm %s1015_s0, %s530_s25  ;;  %s173_s4 = sshll.u32 %s166_s30, 4  ;;  %s174_s4 = int_to_ptr.vmem [resolvable:$true] %s173_s4 }
  0x28   : > { %p932_p2 = pnand %p595_p0, %p909_p12  ;;  %s163_s5 = scalar_lea.sflag [#allocation6], %s162_s11 }
  0x29   : > { %s698_s6 = scalar_lea.vmem %s174_s4, 64  ;;  %s802_s7 = smov [#allocation5]  }
  0x2a   : > { %p687_p3 = pneg %p932_p2  ;;  %p699_p5 = scmp.ne.s32.totalorder %s174_s4, %s698_s6 }
  0x2b   : > { %s703_s10 = sshll.u32 %s802_s7, 4  ;;  %s704_s10 = int_to_ptr.vmem [resolvable:$false] %s703_s10 }
  0x2c   : > { %p701_p7 = pnand %p699_p5, %p687_p3  ;;  %s705_s25 = scalar_lea.vmem %s704_s10, 128 }
  0x2d   : > { %p706_p4 = scmp.lt.s32.totalorder %s174_s4, %s704_s10  ;;  %p707_p9 = scmp.lt.s32.totalorder %s705_s25, %s698_s6 }
  0x2e   : > { %p702_p6 = pneg %p701_p7 }
  0x2f   : > { %p708_p11 = por %p707_p9, %p706_p4 }
  0x31   : > { %p709_p10 = pnand %p708_p11, %p702_p6 }
  0x33   : > { %712 = shalt.err (!%p709_p10)
}
  0x34   : > { %589 = dma.hbm_to_vmem [thread:$0]  (!%p932_p2), %s171_s29, 64, %s174_s4, %s163_s5  }
  0x35   : > { %182 = sbr.rel (%p882_p8) target bundleno = 960 (0x3c0), region = 32  ;;  %s943_s8 = sand.u32 (!%p882_p8), 1, %s781_s13  }
  0x36   : > { %s532_s11 = sshll.u32 (!%p882_p8), %s943_s8, 2  ;;  %s185_s18 = scalar_lea.sflag (!%p882_p8), [#allocation6], %s943_s8 }
  0x37   : > { %s188_s26 = scalar_lea.vmem (!%p882_p8), [#allocation5], %s532_s11  ;;  %p1029_p12 = scmp.ne.s32.totalorder (!%p882_p8), %s1022_s22, 0 }
  0x3a   : > { %764 = dma.done.wait (%p1029_p12), %s185_s18, 64  }
  0x3b   : > { %766 = vsyncadd (%p1029_p12), %s185_s18, 4294967232 }
  0x3c   : > { %768 = dma.done.wait (%p862_p1), [#allocation9], 256  }
  0x3d   : > { %770 = vsyncadd (%p862_p1), [#allocation9], 4294967040  ;;  %v803_v0 = vmov 0.0   ;;  %vm804_vm0 = vmmov 0   ;;  %v653_v1 = vld [vmem:[#allocation8 + $0x8] sm:$0xff]   ;;  %v654_v2 = vld [vmem:[#allocation8] sm:$0xff]  }
  0x3e   : > { %554 = vmatprep.subr.bf16.mxu0 %v803_v0  ;;  %558 = vmatprep.mubr.msk.bf16.mxu0 %vm804_vm0, %v803_v0  ;;  %v220_v3 = vld [vmem:[%s188_s26] sm:$0xf]  ;;  %vm244_vm1 = vcmask 261120   ;;  %v535_v4 = vld [vmem:[%s1017_s2] ss:$0 sm:$0xff]  ;;  %vm289_vm2 = vcmask 257024  }
  0x3f   : > { %562 = vmatprep.subr.bf16.mxu1 %v803_v0  ;;  %564 = vmatprep.mubr.msk.bf16.mxu1 %vm804_vm0, %v803_v0  ;;  %s805_s24 = smov 64   ;;  %s806_s27 = smov 96   ;;  %vm371_vm3 = vcmask 1043456   ;;  %vm356_vm4 = vcmask 64512  }
  0x40   : > { %555 = vmatpush3.bf16.msra.mxu0 %v653_v1  ;;  %s534_s29 = sshll.u32 %s943_s8, 3  ;;  %s543_s30 = sshll.u32 %s789_s15, 7 }
  0x41   : > { %556 = vmatprep.subr.bf16.mxu0 %v803_v0  ;;  %s214_s4 = scalar_lea.vmem [#allocation10], %s534_s29  ;;  %s966_s7 = scalar_lea.hbm %s1018_s3, %s543_s30 }
  0x42   : > { %s433_s21 = sshll.u32 %s214_s4, 4  ;;  %s419_s15 = scalar_lea.sflag [#allocation7], %s943_s8  ;;  %s968_s21 = int_to_ptr.vmem [resolvable:$true] %s433_s21 }
  0x43   : > { %s713_s10 = scalar_lea.vmem %s968_s21, 128  ;;  %s807_s25 = smov [#allocation10]  }
  0x44   : > { %557 = vmatpush3.bf16.msra.mxu0 %v654_v2  ;;  %p714_p1 = scmp.ne.s32.totalorder %s968_s21, %s713_s10  ;;  %s717_s11 = sshll.u32 %s807_s25, 4  ;;  %s718_s11 = int_to_ptr.vmem [resolvable:$false] %s717_s11 }
  0x45   : > { %568 = vmatprep.subr.bf16.mxu0 %v803_v0  ;;  %s719_s18 = scalar_lea.vmem %s718_s11, 256  ;;  %p720_p0 = scmp.lt.s32.totalorder %s968_s21, %s718_s11 }
  0x46   : > { %p715_p8 = pnand %p714_p1, %p915_p13  ;;  %p721_p2 = scmp.lt.s32.totalorder %s719_s18, %s713_s10 }
  0x47   : > { %559 = vmatmul.mubr.msk.bf16.vlgmr.msra.gmra.mxu0 %vm244_vm1, %v220_v3 }
  0x48   : > { %570 = vmatprep.mubr.msk.bf16.mxu0 %vm804_vm0, %v803_v0  ;;  %p716_p10 = pneg %p715_p8  ;;  %p722_p3 = por %p721_p2, %p720_p0 }
  0x4a   : > { %p723_p5 = pnand %p722_p3, %p716_p10 }
 0x107   : > { %v282_v5 = vpop.f32.mrf.mxu0 }
 0x108   : > { %v283_v6 = vadd.f32 %v535_v4, %v282_v5 }
 0x109   : > { %v560_v7 = vpop.f32.mrf.mxu0 }
 0x10a   : > { %v288_v8 = vpack.c.bf16 %v283_v6, %v283_v6 }
 0x10b   : > { %v285_v9 = vpop.f32.mrf.mxu0 }
 0x10c   : > { %298 = vrot.lane.b32.xlu1 %v288_v8, %s805_s24  ;;  %294 = vrot.lane.b32.xlu0 %v288_v8, %s806_s27  ;;  %290 = vst.msk [vmem:[#allocation2] sm:$0xf] %vm289_vm2, %v288_v8 }
 0x10d   : > { %v561_v10 = vpop.f32.mrf.mxu0 }
 0x113   : > { %v307_v17 = vld [vmem:[#allocation2] sm:$0xf] }
 0x17e   : > { %v299_v11 = vpop.permute.xlu1 %298  ;;  %v295_v12 = vpop.permute.xlu0 %294 }
 0x17f   : > { %301 = vst.msk [vmem:[#allocation4] sm:$0xf] %vm289_vm2, %v299_v11  ;;  %297 = vst.msk [vmem:[#allocation3] sm:$0xf] %vm289_vm2, %v295_v12 }
 0x186   : > { %v308_v13 = vld [vmem:[#allocation3] sm:$0xf]  ;;  %v367_v14 = vld [vmem:[#allocation4] sm:$0xf] }
 0x187   : > { %v314_v15 = vsel %vm244_vm1, %v308_v13, 0  ;;  %v373_v16 = vsel %vm371_vm3, %v367_v14, 0 }
 0x188   : > { %563 = vmatpush3.bf16.xpose.msra.mxu1 %v314_v15  ;;  %569 = vmatpush3.bf16.msra.mxu0 %v373_v16 }
 0x18f   : > { %565 = vmatmul.mubr.msk.bf16.vlgmr.msra.gmra.mxu1 %vm244_vm1, %v307_v17 }
 0x24f   : > { %v350_v18 = vpop.f32.mrf.mxu1 }
 0x250   : > { %v357_v19 = vsel %vm356_vm4, %v350_v18, -inf }
 0x251   : > { %358 = vmax.xlane.f32.xlu0 %v357_v19  ;;  %v566_v20 = vpop.f32.mrf.mxu1 }
 0x253   : > { %v353_v21 = vpop.f32.mrf.mxu1 }
 0x255   : > { %v567_v22 = vpop.f32.mrf.mxu1 }
 0x2da   : > { %v359_v23 = vpop.xlane.xlu0 %358 }
 0x2db   : > { %v360_v24 = vsub.f32 %v350_v18, %v359_v23 }
 0x2dd   : > { %v361_v25 = vmul.f32 1.442695, %v360_v24 }
 0x2df   : > { %655 = vpow2.f32 %v361_v25 }
 0x2ec   : > { %v656_v26 = vpop.eup %655 }
 0x2ed   : > { %v363_v27 = vsel %vm356_vm4, %v656_v26, 0.0  ;;  %v366_v28 = vpack.c.bf16 %v656_v26, %v656_v26 }
 0x2ee   : > { %364 = vadd.xlane.f32.xlu1 %v363_v27 }
 0x2ef   : > { %571 = vmatmul.mubr.msk.bf16.vlgmr.msra.gmra.mxu0 %vm356_vm4, %v366_v28 }
 0x377   : > { %v365_v29 = vpop.xlane.xlu1 %364 }
 0x378   : > { %657 = vrcp.f32 %v365_v29 }
 0x385   : > { %v658_v30 = vpop.eup %657 }
 0x3af   : > { %v409_v31 = vpop.f32.mrf.mxu0 }
 0x3b0   : > { %v416_v32 = vmul.f32 %v658_v30, %v409_v31 }
 0x3b1   : > { %v572_v33 = vpop.f32.mrf.mxu0 }
 0x3b2   : > { %417 = vst.msk [vmem:[%s214_s4] sm:$0xff] %vm244_vm1, %v416_v32 }
 0x3b3   : > { %v412_v34 = vpop.f32.mrf.mxu0 }
 0x3b4   : > { %726 = shalt.err (!%p723_p5)
}
 0x3b5   : > { %s727_s26 = scalar_lea.hbm %s966_s7, 128  ;;  %s731_s20 = scalar_lea.hbm %s1018_s3, 256 }
 0x3b6   : > { %p728_p7 = scmp.ne.s32.totalorder %s966_s7, %s727_s26  ;;  %p732_p9 = scmp.lt.s32.totalorder %s966_s7, %s1018_s3 }
 0x3b7   : > { %p733_p11 = scmp.lt.s32.totalorder %s731_s20, %s727_s26 }
 0x3b8   : > { %p729_p6 = pnand %p728_p7, %p915_p13 }
 0x3b9   : > { %p734_p12 = por %p733_p11, %p732_p9 }
 0x3ba   : > { %p730_p4 = pneg %p729_p6 }
 0x3bc   : > { %p735_p1 = pnand %p734_p12, %p730_p4 }
 0x3be   : > { %738 = shalt.err (!%p735_p1)
}
 0x3bf   : > { %580 = dma.vmem_to_hbm [thread:$0]  (%p915_p13), %s968_s21, 128, %s966_s7, %s419_s15   ;;  %v573_v35 = vpop.f32.mrf.mxu0 }
 0x3c0 PF: > { %s445_s29 = sand.u32 1, %s777_s12   ;;  %p1030_p8 = scmp.ne.s32.totalorder %s1023_s23, 0 }
 0x3c1   : > { %p1031_p10 = scmp.ge.s32.totalorder %s797_s17, 2  ;;  %s446_s30 = scalar_lea.sflag [#allocation7], %s445_s29 }
 0x3c3   : > { %p591_p0 = pnand %p1031_p10, %p1030_p8 }
 0x3c5   : > { %p592_p2 = pneg %p591_p0 }
 0x3c7   : > { %772 = dma.done.wait (%p592_p2), %s446_s30, 128  }
 0x3c8   : > { %774 = vsyncadd (%p592_p2), %s446_s30, 4294967168  ;;  %s20_s17 = sadd.s32 1, %s797_s17   ;;  %s1032_s12 = smov %s781_s13 }
 0x3c9   : > { %p17_p3 = scmp.ge.s32.totalorder %s20_s17, 4   ;;  %s1033_s13 = smov %s785_s14 }
 0x3ca   : > { %s1034_s14 = smov %s924_s19  ;;  %s1035_s15 = smov %s793_s16 }
 0x3cb   : > { %s1036_s16 = smov %s1038_s28  ;;  %19 = sbr.rel (!%p17_p3) target bundleno = 7 (0x7), region = 86 }
 0x3d0   :  { %451 = vsyncpa [#allocation6], 1 }
 0x3d1   :  { %453 = vsyncpa [#allocation6 + $0x1], 1 }
 0x3d2   :  { %454 = vsyncpa [#allocation9], 1 }
 0x3d3   :  { %455 = vsyncpa [#allocation7], 1 }
 0x3d4   :  { %457 = vsyncpa [#allocation7 + $0x1], 1 }

</bundles_post_ra>
